<compile_context>
chip_gen: v6e
topology: v6e:2x2x1
jax: 0.10.0
libtpu: 0.0.40
codegen_flags: <defaults>
</compile_context>

<pallas_src>
import jax
import jax.numpy as jnp
from jax import lax
from jax.experimental import pallas as pl
from jax.experimental.pallas import tpu as pltpu


_VMEM_BUDGET = 32 * 1024 * 1024   # conservative scoped-VMEM budget (v7x physical is 64 MiB)


def _round_up(x, m):
    return (x + m - 1) // m * m


# ---------------------------------------------------------------------------
# Kernel
# ---------------------------------------------------------------------------
def _clip_dir_loss_kernel(src_ref, tgt_ref, w_ref, b_ref, dir_ref, out_ref,
                          src_acc, tgt_acc):
    k = pl.program_id(1)

    @pl.when(k == 0)
    def _init():
        src_acc[...] = jnp.zeros_like(src_acc)
        tgt_acc[...] = jnp.zeros_like(tgt_acc)

    # Two separate MXU matmuls into two f32 accumulators -- no in-kernel concat/slice
    # copies.  Images arrive f32 and are cast to bf16 in VMEM right before the dot.
    w = w_ref[...]                                                     # (TK, D) bf16
    src_acc[...] += jnp.dot(src_ref[...].astype(jnp.bfloat16), w,
                            preferred_element_type=jnp.float32)
    tgt_acc[...] += jnp.dot(tgt_ref[...].astype(jnp.bfloat16), w,
                            preferred_element_type=jnp.float32)

    @pl.when(k == pl.num_programs(1) - 1)
    def _finalize():
        se = src_acc[...] + b_ref[...]         # folded preprocess shift
        te = tgt_acc[...] + b_ref[...]
        # get_image_features: x /= x.norm(dim=-1, keepdim=True)   (rsqrt -> EUP slot)
        # NOTE: same zero-norm NaN hazard as the PyTorch in-place divide (no eps, by design).
        se = se * lax.rsqrt(jnp.sum(se * se, axis=-1, keepdims=True))
        te = te * lax.rsqrt(jnp.sum(te * te, axis=-1, keepdims=True))
        # edit direction: (target - src), normalized
        edit = te - se
        edit = edit * lax.rsqrt(jnp.sum(edit * edit, axis=-1, keepdims=True))
        # DirectionLoss('cosine'): both vectors are unit-norm -> cosine == dot product.
        # dot_general(dir (1,D), edit (TB,D)) contracting D yields a lane-dense (1, TB)
        # row directly: no (TB,1) masked partial stores and no transpose/reshape relayout.
        cos = lax.dot_general(dir_ref[...], edit, (((1,), (1,)), ((), ())),
                              preferred_element_type=jnp.float32)
        out_ref[...] = 1.0 - cos


# ---------------------------------------------------------------------------
# Wrapper
# ---------------------------------------------------------------------------
def fold_encoder(scale, shift, w_enc):
    """Fold the per-feature preprocess affine into the linear encoder.  Do this ONCE per
    model (static), not per loss call:  (x*scale + shift) @ W == x @ (scale[:,None]*W) + shift @ W."""
    F, D = w_enc.shape
    w_folded = (scale.reshape(F, 1) * w_enc).astype(jnp.bfloat16)      # (F, D) bf16
    bias = (shift.reshape(1, F) @ w_enc).astype(jnp.float32)           # (1, D) f32
    return w_folded, bias


def _pick_tb(B):
    """Batch tile: <=128 rows, and split into >=2 tiles when possible so v7x's two
    TensorCores both get work along the 'parallel' batch axis."""
    if B > 128:
        return 128
    if B >= 32 and B % 16 == 0:
        return B // 2
    return B          # block dim == full array dim is always a legal BlockSpec


def _pick_tk(F, TB, D, budget=_VMEM_BUDGET):
    """Contraction tile from the scoped-VMEM budget:
       2 inputs x 2 buffers x TB*TK*4B (f32 images)  +  2 buffers x TK*D*2B (bf16 weights)
       + 2 x TB*D*4B (f32 accumulators) + small (bias/dir/out)."""
    fixed = 2 * TB * D * 4 + 4 * D * 4 + 2 * TB * 4
    per_tk = 2 * 2 * TB * 4 + 2 * D * 2
    tk_max = max(128, (budget - fixed) // per_tk)
    if F <= tk_max:
        return F
    tk = min(tk_max, F) // 128 * 128
    while tk >= 128 and F % tk != 0:
        tk -= 128
    return tk if tk >= 128 else F


def clip_directional_loss(src_img, tgt_img, w_folded, bias, text_dir,
                          *, lambda_direction=1.0, tk=None):
    """src_img/tgt_img: (B, F) flattened NCHW images (f32); w_folded: (F, D) bf16 folded
    encoder; bias: (1, D) f32 folded shift; text_dir: (1, D) L2-normalized text direction."""
    B, F = src_img.shape
    D = w_folded.shape[1]

    TB = _pick_tb(B)
    B_pad = _round_up(B, TB)
    src, tgt = src_img, tgt_img
    if B_pad != B:
        # TODO(synk): at real sizes replace this HBM copy with in-kernel row masking
        # (scalar-prefetched B + broadcasted_iota); padded rows' (NaN) losses are dropped below.
        pad = ((0, B_pad - B), (0, 0))
        src = jnp.pad(src, pad)
        tgt = jnp.pad(tgt, pad)

    if tk is None:
        tk = _pick_tk(F, TB, D)
    assert F % tk == 0 and (tk % 128 == 0 or tk == F), (F, tk)

    n_bt = B_pad // TB
    n_kt = F // tk

    per_row = pl.pallas_call(
        _clip_dir_loss_kernel,
        out_shape=jax.ShapeDtypeStruct((n_bt, TB), jnp.float32),
        grid_spec=pltpu.PrefetchScalarGridSpec(
            num_scalar_prefetch=0,
            grid=(n_bt, n_kt),                                   # reduction (F) axis last
            in_specs=[
                pl.BlockSpec((TB, tk), lambda i, k: (i, k)),     # src tile (f32, cast in kernel)
                pl.BlockSpec((TB, tk), lambda i, k: (i, k)),     # tgt tile
                pl.BlockSpec((tk, D), lambda i, k: (k, 0)),      # folded encoder weights (bf16)
                pl.BlockSpec((1, D), lambda i, k: (0, 0)),       # folded bias   (tiny, grid-invariant)
                pl.BlockSpec((1, D), lambda i, k: (0, 0)),       # text direction (tiny, grid-invariant)
            ],
            out_specs=pl.BlockSpec((1, TB), lambda i, k: (i, 0)),   # lane-dense per-row losses
            scratch_shapes=[pltpu.VMEM((TB, D), jnp.float32),       # src embedding accumulator
                            pltpu.VMEM((TB, D), jnp.float32)],      # tgt embedding accumulator
        ),
        compiler_params=pltpu.CompilerParams(
            dimension_semantics=("parallel", "arbitrary"),
            vmem_limit_bytes=_VMEM_BUDGET,
        ),
    )(src, tgt, w_folded, bias, text_dir)

    # final .mean() over the real batch rows (tiny wrapper reduction over B scalars)
    return lambda_direction * jnp.mean(per_row.reshape(-1)[:B])


def build_preprocess_affine(C, H, W):
    """Fold Normalize(mean=-1, std=2) and CLIP Normalize(mean, std) into scale/shift per feature."""
    clip_mean = jnp.array([0.48145466, 0.4578275, 0.40821073], dtype=jnp.float32)
    clip_std = jnp.array([0.26862954, 0.26130258, 0.27577711], dtype=jnp.float32)
    # x_pre = ((x + 1)/2 - clip_mean) / clip_std = x * (1/(2*std)) + (0.5 - mean)/std
    scale_c = 1.0 / (2.0 * clip_std)
    shift_c = (0.5 - clip_mean) / clip_std
    scale = jnp.broadcast_to(scale_c[:, None, None], (C, H, W)).reshape(1, C * H * W)
    shift = jnp.broadcast_to(shift_c[:, None, None], (C, H, W)).reshape(1, C * H * W)
    # TODO(synk): clip_preprocess Resize/CenterCrop skipped; inputs assumed already at encoder res.
    return scale, shift


if __name__ == "__main__":
    B, C, H, W = 2, 3, 16, 16      # small synthetic "images" in [-1, 1], NCHW
    F = C * H * W                  # 768 flattened features
    D = 256                        # synthetic CLIP embedding dim
    T = 4                          # number of text templates

    key = jax.random.PRNGKey(0)
    k_src, k_tgt, k_w, k_txt, k_mean = jax.random.split(key, 5)

    src_img = jax.random.uniform(k_src, (B, C, H, W), jnp.float32, -1.0, 1.0)
    tgt_img = jax.random.uniform(k_tgt, (B, C, H, W), jnp.float32, -1.0, 1.0)

    # deterministic synthetic encoder weights + text features
    # TODO(synk): real CLIP ViT-B/32 image encoder replaced by a single linear projection.
    w_enc = jax.random.normal(k_w, (F, D), jnp.float32) * (1.0 / jnp.sqrt(F))
    text_features = jax.random.normal(k_txt, (T, D), jnp.float32)
    text_features = text_features / jnp.linalg.norm(text_features, axis=-1, keepdims=True)
    clip_mean_vec = jax.random.normal(k_mean, (D,), jnp.float32) * 0.1

    # compute_text_direction: (text_features - clip_mean).mean(0, keepdim), normalized
    # TODO(synk): real CLIP text transformer replaced by deterministic synthetic features.
    text_dir = jnp.mean(text_features - clip_mean_vec[None, :], axis=0, keepdims=True)
    text_dir = text_dir / jnp.linalg.norm(text_dir, axis=-1, keepdims=True)

    scale, shift = build_preprocess_affine(C, H, W)

    # Static, once-per-model fold (NOT per loss call).
    w_folded, bias = fold_encoder(scale, shift, w_enc)

    src_flat = src_img.reshape(B, F)
    tgt_flat = tgt_img.reshape(B, F)

    # tk=256 (< F=768) so the demo exercises the 3-step K-tiled accumulation path.
    loss = clip_directional_loss(src_flat, tgt_flat, w_folded, bias, text_dir, tk=256)
    loss = jax.block_until_ready(loss)

    # pure-JAX f32 reference (same math as the PyTorch module with lambda_direction=1.0;
    # degenerate zero-norm rows NaN in both, matching torch's in-place divides)
    def ref():
        s = src_flat * scale + shift
        t = tgt_flat * scale + shift
        se = s @ w_enc
        te = t @ w_enc
        se = se / jnp.linalg.norm(se, axis=-1, keepdims=True)
        te = te / jnp.linalg.norm(te, axis=-1, keepdims=True)
        e = te - se
        e = e / jnp.linalg.norm(e, axis=-1, keepdims=True)
        cos = jnp.sum(e * text_dir, axis=-1)
        return jnp.mean(1.0 - cos)

    # tolerance relaxed vs the pure-f32 path because images/weights enter the MXU in bf16
    assert jnp.allclose(loss, ref(), atol=2e-2, rtol=2e-2), (loss, ref())
    print("KERNEL_OK")
</pallas_src>

<mosaic_0001>
module attributes {stable_mosaic.version = 11 : i64} {
  func.func @_clip_dir_loss_kernel(%arg0: i32, %arg1: i32, %arg2: memref<2x256xf32, #tpu.memory_space<vmem>>, %arg3: memref<2x256xf32, #tpu.memory_space<vmem>>, %arg4: memref<256x256xbf16, #tpu.memory_space<vmem>>, %arg5: memref<1x256xf32, #tpu.memory_space<vmem>>, %arg6: memref<1x256xf32, #tpu.memory_space<vmem>>, %arg7: memref<1x2xf32, #tpu.memory_space<vmem>>, %arg8: memref<2x256xf32, #tpu.memory_space<vmem>>, %arg9: memref<2x256xf32, #tpu.memory_space<vmem>>) attributes {dimension_semantics = [#tpu.dimension_semantics<parallel>, #tpu.dimension_semantics<arbitrary>], iteration_bounds = array<i64: 1, 3>, scalar_prefetch = 0 : i64, scratch_operands = 2 : i64, tpu.core_type = #tpu.core_type<tc>, window_params = [{transform_indices = @transform_0, window_bounds = array<i64: 2, 256>}, {transform_indices = @transform_1, window_bounds = array<i64: 2, 256>}, {transform_indices = @transform_2, window_bounds = array<i64: 256, 256>}, {pipeline_mode = #tpu.pipeline_mode<synchronous>, transform_indices = @transform_3, window_bounds = array<i64: 1, 256>}, {pipeline_mode = #tpu.pipeline_mode<synchronous>, transform_indices = @transform_4, window_bounds = array<i64: 1, 256>}, {transform_indices = @transform_5, window_bounds = array<i64: 1, 2>}]} {
    %c0_i32 = arith.constant 0 : i32
    %0 = arith.cmpi eq, %arg1, %c0_i32 : i32
    %1 = arith.extui %0 : i1 to i32
    %c0_i32_0 = arith.constant 0 : i32
    %2 = arith.cmpi ne, %1, %c0_i32_0 : i32
    scf.if %2 {
      %cst_16 = arith.constant 0.000000e+00 : f32
      %19 = vector.broadcast %cst_16 : f32 to vector<2x256xf32>
      %c0_17 = arith.constant 0 : index
      %c0_18 = arith.constant 0 : index
      %20 = vector.load %arg8[%c0_17, %c0_18] : memref<2x256xf32, #tpu.memory_space<vmem>>, vector<2x256xf32>
      tpu.vector_store %arg8[%c0_17, %c0_18], %19 {strides = array<i32>} : memref<2x256xf32, #tpu.memory_space<vmem>>, vector<2x256xf32>,
      %cst_19 = arith.constant 0.000000e+00 : f32
      %21 = vector.broadcast %cst_19 : f32 to vector<2x256xf32>
      %c0_20 = arith.constant 0 : index
      %c0_21 = arith.constant 0 : index
      %22 = vector.load %arg9[%c0_20, %c0_21] : memref<2x256xf32, #tpu.memory_space<vmem>>, vector<2x256xf32>
      tpu.vector_store %arg9[%c0_20, %c0_21], %21 {strides = array<i32>} : memref<2x256xf32, #tpu.memory_space<vmem>>, vector<2x256xf32>,
    } else {
    }
    %c0 = arith.constant 0 : index
    %c0_1 = arith.constant 0 : index
    %3 = vector.load %arg4[%c0, %c0_1] : memref<256x256xbf16, #tpu.memory_space<vmem>>, vector<256x256xbf16>
    %c0_2 = arith.constant 0 : index
    %c0_3 = arith.constant 0 : index
    %4 = vector.load %arg8[%c0_2, %c0_3] : memref<2x256xf32, #tpu.memory_space<vmem>>, vector<2x256xf32>
    %c0_4 = arith.constant 0 : index
    %c0_5 = arith.constant 0 : index
    %5 = vector.load %arg2[%c0_4, %c0_5] : memref<2x256xf32, #tpu.memory_space<vmem>>, vector<2x256xf32>
    %6 = arith.truncf %5 : vector<2x256xf32> to vector<2x256xbf16>
    %cst = arith.constant dense<0.000000e+00> : vector<2x256xf32>
    %7 = tpu.matmul %6, %3, %cst {dimension_numbers = #tpu.dot_dimension_numbers<[1], [0], [0], [1], [0, 0, 1, 1], [], []>} : vector<2x256xbf16>, vector<256x256xbf16>, vector<2x256xf32> -> vector<2x256xf32>
    %8 = arith.addf %4, %7 : vector<2x256xf32>
    %c0_6 = arith.constant 0 : index
    %c0_7 = arith.constant 0 : index
    %9 = vector.load %arg8[%c0_6, %c0_7] : memref<2x256xf32, #tpu.memory_space<vmem>>, vector<2x256xf32>
    tpu.vector_store %arg8[%c0_6, %c0_7], %8 {strides = array<i32>} : memref<2x256xf32, #tpu.memory_space<vmem>>, vector<2x256xf32>,
    %c0_8 = arith.constant 0 : index
    %c0_9 = arith.constant 0 : index
    %10 = vector.load %arg9[%c0_8, %c0_9] : memref<2x256xf32, #tpu.memory_space<vmem>>, vector<2x256xf32>
    %c0_10 = arith.constant 0 : index
    %c0_11 = arith.constant 0 : index
    %11 = vector.load %arg3[%c0_10, %c0_11] : memref<2x256xf32, #tpu.memory_space<vmem>>, vector<2x256xf32>
    %12 = arith.truncf %11 : vector<2x256xf32> to vector<2x256xbf16>
    %cst_12 = arith.constant dense<0.000000e+00> : vector<2x256xf32>
    %13 = tpu.matmul %12, %3, %cst_12 {dimension_numbers = #tpu.dot_dimension_numbers<[1], [0], [0], [1], [0, 0, 1, 1], [], []>} : vector<2x256xbf16>, vector<256x256xbf16>, vector<2x256xf32> -> vector<2x256xf32>
    %14 = arith.addf %10, %13 : vector<2x256xf32>
    %c0_13 = arith.constant 0 : index
    %c0_14 = arith.constant 0 : index
    %15 = vector.load %arg9[%c0_13, %c0_14] : memref<2x256xf32, #tpu.memory_space<vmem>>, vector<2x256xf32>
    tpu.vector_store %arg9[%c0_13, %c0_14], %14 {strides = array<i32>} : memref<2x256xf32, #tpu.memory_space<vmem>>, vector<2x256xf32>,
    %c2_i32 = arith.constant 2 : i32
    %16 = arith.cmpi eq, %arg1, %c2_i32 : i32
    %17 = arith.extui %16 : i1 to i32
    %c0_i32_15 = arith.constant 0 : i32
    %18 = arith.cmpi ne, %17, %c0_i32_15 : i32
    scf.if %18 {
      %c0_16 = arith.constant 0 : index
      %c0_17 = arith.constant 0 : index
      %19 = vector.load %arg8[%c0_16, %c0_17] : memref<2x256xf32, #tpu.memory_space<vmem>>, vector<2x256xf32>
      %c0_18 = arith.constant 0 : index
      %c0_19 = arith.constant 0 : index
      %20 = vector.load %arg5[%c0_18, %c0_19] : memref<1x256xf32, #tpu.memory_space<vmem>>, vector<1x256xf32>
      %21 = vector.broadcast %20 : vector<1x256xf32> to vector<2x256xf32>
      %22 = arith.addf %19, %21 : vector<2x256xf32>
      %c0_20 = arith.constant 0 : index
      %c0_21 = arith.constant 0 : index
      %23 = vector.load %arg9[%c0_20, %c0_21] : memref<2x256xf32, #tpu.memory_space<vmem>>, vector<2x256xf32>
      %c0_22 = arith.constant 0 : index
      %c0_23 = arith.constant 0 : index
      %24 = vector.load %arg5[%c0_22, %c0_23] : memref<1x256xf32, #tpu.memory_space<vmem>>, vector<1x256xf32>
      %25 = vector.broadcast %24 : vector<1x256xf32> to vector<2x256xf32>
      %26 = arith.addf %23, %25 : vector<2x256xf32>
      %27 = arith.mulf %22, %22 : vector<2x256xf32>
      %cst_24 = arith.constant dense<0.000000e+00> : vector<2xf32>
      %28 = vector.multi_reduction <add>, %27, %cst_24 [1] : vector<2x256xf32> to vector<2xf32>
      %29 = vector.shape_cast %28 : vector<2xf32> to vector<2x1xf32>
      %30 = math.rsqrt %29 : vector<2x1xf32>
      %31 = vector.broadcast %30 : vector<2x1xf32> to vector<2x256xf32>
      %32 = arith.mulf %22, %31 : vector<2x256xf32>
      %33 = arith.mulf %26, %26 : vector<2x256xf32>
      %cst_25 = arith.constant dense<0.000000e+00> : vector<2xf32>
      %34 = vector.multi_reduction <add>, %33, %cst_25 [1] : vector<2x256xf32> to vector<2xf32>
      %35 = vector.shape_cast %34 : vector<2xf32> to vector<2x1xf32>
      %36 = math.rsqrt %35 : vector<2x1xf32>
      %37 = vector.broadcast %36 : vector<2x1xf32> to vector<2x256xf32>
      %38 = arith.mulf %26, %37 : vector<2x256xf32>
      %39 = arith.subf %38, %32 : vector<2x256xf32>
      %40 = arith.mulf %39, %39 : vector<2x256xf32>
      %cst_26 = arith.constant dense<0.000000e+00> : vector<2xf32>
      %41 = vector.multi_reduction <add>, %40, %cst_26 [1] : vector<2x256xf32> to vector<2xf32>
      %42 = vector.shape_cast %41 : vector<2xf32> to vector<2x1xf32>
      %43 = math.rsqrt %42 : vector<2x1xf32>
      %44 = vector.broadcast %43 : vector<2x1xf32> to vector<2x256xf32>
      %45 = arith.mulf %39, %44 : vector<2x256xf32>
      %c0_27 = arith.constant 0 : index
      %c0_28 = arith.constant 0 : index
      %46 = vector.load %arg6[%c0_27, %c0_28] : memref<1x256xf32, #tpu.memory_space<vmem>>, vector<1x256xf32>
      %cst_29 = arith.constant dense<0.000000e+00> : vector<1x2xf32>
      %47 = tpu.matmul %46, %45, %cst_29 {dimension_numbers = #tpu.dot_dimension_numbers<[1], [1], [0], [0], [0, 0, 1, 0], [], []>} : vector<1x256xf32>, vector<2x256xf32>, vector<1x2xf32> -> vector<1x2xf32>
      %cst_30 = arith.constant 1.000000e+00 : f32
      %48 = vector.broadcast %cst_30 : f32 to vector<1x2xf32>
      %49 = arith.subf %48, %47 : vector<1x2xf32>
      %c0_31 = arith.constant 0 : index
      %c0_32 = arith.constant 0 : index
      %50 = vector.load %arg7[%c0_31, %c0_32] : memref<1x2xf32, #tpu.memory_space<vmem>>, vector<1x2xf32>
      tpu.vector_store %arg7[%c0_31, %c0_32], %49 {strides = array<i32>} : memref<1x2xf32, #tpu.memory_space<vmem>>, vector<1x2xf32>,
    } else {
    }
    return
  }
  func.func @transform_0(%arg0: i32, %arg1: i32) -> (i32, i32) {
    %c0_i32 = arith.constant 0 : i32
    return %arg0, %arg1 : i32, i32
  }
  func.func @transform_1(%arg0: i32, %arg1: i32) -> (i32, i32) {
    %c0_i32 = arith.constant 0 : i32
    return %arg0, %arg1 : i32, i32
  }
  func.func @transform_2(%arg0: i32, %arg1: i32) -> (i32, i32) {
    %c0_i32 = arith.constant 0 : i32
    %c0_i32_0 = arith.constant 0 : i32
    return %arg1, %c0_i32 : i32, i32
  }
  func.func @transform_3(%arg0: i32, %arg1: i32) -> (i32, i32) {
    %c0_i32 = arith.constant 0 : i32
    %c0_i32_0 = arith.constant 0 : i32
    %c0_i32_1 = arith.constant 0 : i32
    return %c0_i32, %c0_i32_0 : i32, i32
  }
  func.func @transform_4(%arg0: i32, %arg1: i32) -> (i32, i32) {
    %c0_i32 = arith.constant 0 : i32
    %c0_i32_0 = arith.constant 0 : i32
    %c0_i32_1 = arith.constant 0 : i32
    return %c0_i32, %c0_i32_0 : i32, i32
  }
  func.func @transform_5(%arg0: i32, %arg1: i32) -> (i32, i32) {
    %c0_i32 = arith.constant 0 : i32
    %c0_i32_0 = arith.constant 0 : i32
    return %arg0, %c0_i32 : i32, i32
  }
}

</mosaic_0001>

<bundles_post_ra>
// kernel: tpu_custom_call.1
= control target key start
LH: loop header
LB: loop body
LE: loop exit
PB: predicated region body
PF: predicated region fallthrough
CT: control target
= control target key end

     0   :  { %s1632_s0 = inlined_call_operand.hbm [shape: f32[2,768], index: 0, kind: input, shape index: {}]   ;;  %s1633_s1 = inlined_call_operand.hbm [shape: f32[2,768], index: 1, kind: input, shape index: {}]   ;;  %s1634_s2 = inlined_call_operand.hbm [shape: bf16[768,256], index: 2, kind: input, shape index: {}]   ;;  %s1635_s3 = inlined_call_operand.vmem [shape: f32[1,256], index: 3, kind: input, shape index: {}]   ;;  %s1636_s4 = inlined_call_operand.vmem [shape: f32[1,256], index: 4, kind: input, shape index: {}]   ;;  %s1637_s5 = inlined_call_operand.hbm [shape: f32[1,2], index: 5, kind: output, shape index: {}]  }
   0x1   :  { %1639 = sst [smem:[#allocation15_spill]] %s1633_s1 }
   0x2   :  { %10 = vsyncpa [#allocation5], 0 }
   0x3   :  { %12 = vsyncpa [#allocation5 + $0x1], 0 }
   0x4   :  { %13 = vsyncpa [#allocation8], 0 }
   0x5   :  { %15 = vsyncpa [#allocation8 + $0x1], 0 }
   0x6   :  { %16 = vsyncpa [#allocation6], 0  ;;  %s1396_s18 = smov 0   ;;  %s1398_s19 = smov 0  }
   0x7   :  { %s1400_s20 = smov 0   ;;  %s1402_s21 = smov 0  }
   0x8   :  { %s1404_s22 = smov 0   ;;  %s1406_s23 = smov 0  }
   0x9 LB: > { %s1425_s24 = sadd.s32 4294967295, %s1355_s23   ;;  %s31_s25 = sadd.s32 1, %s1351_s22  ;;  %s1355_s23 = sphi %s1406_s23, %s22_s23   ;;  %s1351_s22 = sphi %s1404_s22, %s1650_s22   ;;  %s1347_s21 = sphi %s1402_s21, %s1649_s21   ;;  %s1343_s20 = sphi %s1400_s20, %s1648_s20   ;;  %s1339_s19 = sphi %s1398_s19, %s1647_s19   ;;  %s1335_s18 = sphi %s1396_s18, %s1646_s18  }
   0xa   : > { %p32_p0 = scmp.ge.s32.totalorder %s31_s25, 3  ;;  %s43_s26 = sadd.s32 1, %s1343_s20 }
   0xb   : > { %p50_p1 = scmp.ne.s32.totalorder %s1343_s20, %s1339_s19  ;;  %p51_p2 = scmp.eq.s32.totalorder %s1355_s23, 0 }
   0xc   : > { %s1652_s25 = smov (%p32_p0, %s31_s25), 0  ;;  %p56_p4 = scmp.ne.s32.totalorder %s1339_s19, %s1335_s18 }
   0xd   : > { %1640 = sst [smem:[#allocation14_spill]] %s1652_s25  ;;  %p52_p3 = por %p51_p2, %p50_p1 }
   0xe   : > { %s39_s27 = ssub.s32 %s1351_s22, %s1652_s25  ;;  %p57_p5 = scmp.eq.s32.totalorder %s1425_s24, 0 }
   0xf   : > { %p41_p6 = scmp.eq.s32.totalorder %s39_s27, 0  ;;  %p1078_p8 = scmp.lt.s32.totalorder %s1355_s23, 3 }
  0x10   : > { %p1438_p7 = por %p57_p5, %p56_p4  ;;  %s1447_s30 = sand.u32 1, %s1343_s20  }
  0x11   : > { %s1444_s29 = scalar_select %p41_p6, %s1343_s20, %s43_s26  }
  0x12   : > { %s1054_s6 = sshll.u32 %s1351_s22, 6  ;;  %s1000_s7 = sshll.u32 %s1447_s30, 2 }
  0x13   : > { %p1451_p9 = pnand %p1078_p8, %p52_p3  ;;  %s229_s9 = sand.u32 1, %s1355_s23  }
  0x14   : > { %s1643_s1 = sld [smem:[#allocation15_spill]]  ;;  %s233_s13 = scalar_lea.vmem [#allocation7], %s1000_s7 }
  0x15   : > { %s243_s14 = sshll.u32 %s233_s13, 4  ;;  %s1006_s15 = sshll.u32 %s1447_s30, 8  ;;  %s244_s14 = int_to_ptr.vmem [resolvable:$true] %s243_s14 }
  0x16   : > { %s1464_s16 = scalar_lea.sflag [#allocation8], %s229_s9  ;;  %p1191_p10 = pneg %p1451_p9 }
  0x17   : > { %s1202_s17 = scalar_lea.vmem %s244_s14, 64  ;;  %s1357_s18 = smov [#allocation7]  }
  0x18   : > { %p1203_p11 = scmp.ne.s32.totalorder %s244_s14, %s1202_s17  ;;  %s1207_s26 = sshll.u32 %s1357_s18, 4  ;;  %s1208_s26 = int_to_ptr.vmem [resolvable:$false] %s1207_s26 }
  0x19   : > { %s1209_s27 = scalar_lea.vmem %s1208_s26, 128  ;;  %p1210_p0 = scmp.lt.s32.totalorder %s244_s14, %s1208_s26 }
  0x1a   : > { %s241_s12 = scalar_lea.hbm %s1643_s1, %s1054_s6  ;;  %p1205_p12 = pnand %p1203_p11, %p1191_p10 }
  0x1b   : > { %p1211_p1 = scmp.lt.s32.totalorder %s1209_s27, %s1202_s17 }
  0x1c   : > { %p1206_p13 = pneg %p1205_p12 }
  0x1d   : > { %p1212_p2 = por %p1211_p1, %p1210_p0 }
  0x1f   : > { %p1213_p3 = pnand %p1212_p2, %p1206_p13 }
  0x21   : > { %1216 = shalt.err (!%p1213_p3)
}
  0x22   : > { %1074 = dma.hbm_to_vmem [thread:$0]  (!%p1451_p9), %s241_s12, 64, %s244_s14, %s1464_s16  }
  0x23   : > { %p1010_p4 = scmp.ge.s32.totalorder %s1355_s23, 1  ;;  %s254_s9 = scalar_lea.vmem [#allocation9], %s1006_s15 }
  0x24   : > { %s262_s10 = sshll.u32 %s254_s9, 4  ;;  %p270_p5 = scmp.lt.s32.totalorder %s1355_s23, 4  ;;  %s1476_s10 = int_to_ptr.vmem [resolvable:$true] %s262_s10 }
  0x25   : > { %s220_s18 = scalar_lea.hbm %s1632_s0, %s1054_s6  ;;  %s212_s26 = scalar_lea.vmem [#allocation4], %s1000_s7 }
  0x26   : > { %p1478_p6 = pnand %p1010_p4, %p270_p5  ;;  %s222_s27 = sshll.u32 %s212_s26, 4  ;;  %s223_s27 = int_to_ptr.vmem [resolvable:$true] %s222_s27 }
  0x27   : > { %s1057_s12 = sshll.u32 %s1351_s22, 12  ;;  %s209_s14 = scalar_lea.sflag [#allocation5], %s1447_s30 }
  0x28   : > { %s1230_s15 = scalar_lea.vmem %s223_s27, 64  ;;  %s1358_s9 = smov [#allocation4]  }
  0x29   : > { %p1231_p8 = scmp.ne.s32.totalorder %s223_s27, %s1230_s15  ;;  %s1235_s1 = sshll.u32 %s1358_s9, 4  ;;  %s1236_s1 = int_to_ptr.vmem [resolvable:$false] %s1235_s1 }
  0x2a   : > { %s1237_s25 = scalar_lea.vmem %s1236_s1, 128  ;;  %p1238_p13 = scmp.lt.s32.totalorder %s223_s27, %s1236_s1 }
  0x2b   : > { %p1233_p11 = pnand %p1231_p8, %p1191_p10  ;;  %p1239_p0 = scmp.lt.s32.totalorder %s1237_s25, %s1230_s15 }
  0x2d   : > { %p1234_p12 = pneg %p1233_p11  ;;  %p1240_p1 = por %p1239_p0, %p1238_p13 }
  0x2f   : > { %p1241_p2 = pnand %p1240_p1, %p1234_p12 }
  0x31   : > { %1244 = shalt.err (!%p1241_p2)
}
  0x32   : > { %1071 = dma.hbm_to_vmem [thread:$0]  (!%p1451_p9), %s220_s18, 64, %s223_s27, %s209_s14  }
  0x33   : > { %s261_s7 = scalar_lea.hbm %s1634_s2, %s1057_s12  ;;  %s1258_s13 = scalar_lea.vmem %s1476_s10, 4096 }
  0x34   : > { %p1259_p3 = scmp.ne.s32.totalorder %s1476_s10, %s1258_s13  ;;  %s1359_s1 = smov [#allocation9]  }
  0x35   : > { %s1263_s25 = sshll.u32 %s1359_s1, 4  ;;  %s1264_s25 = int_to_ptr.vmem [resolvable:$false] %s1263_s25 }
  0x36   : > { %p1261_p4 = pnand %p1259_p3, %p1191_p10  ;;  %s1265_s17 = scalar_lea.vmem %s1264_s25, 8192 }
  0x37   : > { %p1266_p8 = scmp.lt.s32.totalorder %s1476_s10, %s1264_s25  ;;  %p1267_p11 = scmp.lt.s32.totalorder %s1265_s17, %s1258_s13 }
  0x38   : > { %p1262_p5 = pneg %p1261_p4 }
  0x39   : > { %p1268_p12 = por %p1267_p11, %p1266_p8 }
  0x3b   : > { %p1269_p13 = pnand %p1268_p12, %p1262_p5 }
  0x3d   : > { %1272 = shalt.err (!%p1269_p13)
}
  0x3e   : > { %s1360_s18 = smov 128   ;;  %s1361_s26 = smov 8  }
  0x3f   : > { %1077 = dma.hbm_to_vmem [thread:$0]  (!%p1451_p9), %s261_s7, 4096, %s1476_s10, %s1464_s16, %s1360_s18, %s1360_s18, %s1361_s26  }
  0x40   : > { %274 = sbr.rel (%p1478_p6) target bundleno = 914 (0x392), region = 40  ;;  %s276_s27 = sand.u32 (!%p1478_p6), 1, %s1339_s19  }
  0x41   : > { %s1011_s12 = sshll.u32 (!%p1478_p6), %s276_s27, 2  ;;  %s277_s14 = scalar_lea.sflag (!%p1478_p6), [#allocation5], %s276_s27 }
  0x42   : > { %s1512_s15 = scalar_lea.vmem (!%p1478_p6), [#allocation4], %s1011_s12 }
  0x45   : > { %1322 = dma.done.wait (%p1438_p7), %s277_s14, 64  }
  0x46   : > { %1324 = vsyncadd (%p1438_p7), %s277_s14, 4294967232  ;;  %s285_s9 = sand.u32 1, %s1425_s24   ;;  %s1519_s16 = scalar_lea.vmem [#allocation7], %s1011_s12 }
  0x47   : > { %s286_s8 = scalar_lea.sflag [#allocation8], %s285_s9 }
  0x48   : > { %1326 = dma.done.wait (%p1438_p7), %s286_s8, 4160  }
  0x49   : > { %1328 = vsyncadd (%p1438_p7), %s286_s8, 4294963136  ;;  %s1013_s10 = sshll.u32 %s276_s27, 8  ;;  %p1014_p9 = scmp.ne.s32.totalorder %s1347_s21, 0 }
  0x4a   : > { %s1525_s11 = scalar_lea.vmem [#allocation9], %s1013_s10 }
  0x4b   : > { %336 = sbr.rel (%p1014_p9) target bundleno = 82 (0x52), region = 56 }
  0x50   : > { %v1362_v0 = vmov 0.0  }
  0x51   : > { %337 = vst [vmem:[#allocation2] sm:$0xf] %v1362_v0  ;;  %338 = vst [vmem:[#allocation3] sm:$0xf] %v1362_v0 }
  0x52 PF: > { %v1135_v1 = vld [vmem:[%s1525_s11 + $0x74] ss:$8 sps:$4 sm:$0xff]   ;;  %v1137_v2 = vld [vmem:[%s1525_s11 + $0x70] ss:$8 sps:$4 sm:$0xff]   ;;  %v1138_v3 = vld [vmem:[%s1525_s11 + $0x64] ss:$8 sps:$4 sm:$0xff]   ;;  %v593_v43 = vlaneseq }
  0x53   : > { %546 = vmatprep.subr.bf16.mxu0 %v1135_v1  ;;  %615 = vmatprep.subr.bf16.mxu1 %v1135_v1  ;;  %v1140_v4 = vld [vmem:[%s1525_s11 + $0x60] ss:$8 sps:$4 sm:$0xff]   ;;  %v1141_v5 = vld [vmem:[%s1525_s11 + $0x54] ss:$8 sps:$4 sm:$0xff]   ;;  %v1143_v6 = vld [vmem:[%s1525_s11 + $0x50] ss:$8 sps:$4 sm:$0xff]  }
  0x54   : > { %547 = vmatpush1.bf16.msra.mxu0 %v1137_v2  ;;  %616 = vmatpush1.bf16.msra.mxu1 %v1137_v2  ;;  %v1144_v7 = vld [vmem:[%s1525_s11 + $0x44] ss:$8 sps:$4 sm:$0xff]   ;;  %v1146_v8 = vld [vmem:[%s1525_s11 + $0x40] ss:$8 sps:$4 sm:$0xff]   ;;  %v1147_v9 = vld [vmem:[%s1525_s11 + $0x34] ss:$8 sps:$4 sm:$0xff]  }
  0x55   : > { %548 = vmatprep.subr.bf16.mxu0 %v1138_v3  ;;  %617 = vmatprep.subr.bf16.mxu1 %v1138_v3  ;;  %v1149_v10 = vld [vmem:[%s1525_s11 + $0x30] ss:$8 sps:$4 sm:$0xff]   ;;  %v1150_v11 = vld [vmem:[%s1525_s11 + $0x24] ss:$8 sps:$4 sm:$0xff]   ;;  %v1152_v12 = vld [vmem:[%s1525_s11 + $0x20] ss:$8 sps:$4 sm:$0xff]  }
  0x56   : > { %v1153_v13 = vld [vmem:[%s1525_s11 + $0x14] ss:$8 sps:$4 sm:$0xff]   ;;  %v1155_v17 = vld [vmem:[%s1525_s11 + $0x10] ss:$8 sps:$4 sm:$0xff]   ;;  %v1156_v19 = vld [vmem:[%s1525_s11 + $0x4] ss:$8 sps:$4 sm:$0xff]  }
  0x57   : > { %v1542_v14 = vld.sshfl [vmem:[%s1512_s15] sm:$0x33 pattern:$0x76325410]  ;;  %v1158_v22 = vld [vmem:[%s1525_s11] ss:$8 sps:$4 sm:$0xff]  }
  0x58   : > { %549 = vmatpush1.bf16.msra.mxu0 %v1140_v4  ;;  %618 = vmatpush1.bf16.msra.mxu1 %v1140_v4  ;;  %v381_v15 = vcombine.high %v1542_v14, %v1542_v14  ;;  %v1547_v16 = vld.sshfl [vmem:[%s1519_s16] sm:$0x33 pattern:$0x76325410]  ;;  %v1162_v25 = vld [vmem:[%s1525_s11 + $0xe4] ss:$8 sps:$4 sm:$0xff]   ;;  %v384_v39 = vpack.c.bf16 %v1542_v14, %v1542_v14 }
  0x59   : > { %550 = vmatprep.subr.bf16.mxu0 %v1141_v5  ;;  %619 = vmatprep.subr.bf16.mxu1 %v1141_v5  ;;  %v610_v18 = vcombine.high %v1547_v16, %v1547_v16  ;;  %v1159_v23 = vld [vmem:[%s1525_s11 + $0xf4] ss:$8 sps:$4 sm:$0xff]   ;;  %v1161_v24 = vld [vmem:[%s1525_s11 + $0xf0] ss:$8 sps:$4 sm:$0xff]   ;;  %v1164_v26 = vld [vmem:[%s1525_s11 + $0xe0] ss:$8 sps:$4 sm:$0xff]   ;;  %v613_v40 = vpack.c.bf16 %v1547_v16, %v1547_v16 }
  0x5a   : > { %v385_v20 = vpack.c.bf16 %v381_v15, %v381_v15  ;;  %v1165_v27 = vld [vmem:[%s1525_s11 + $0xd4] ss:$8 sps:$4 sm:$0xff]   ;;  %v1167_v28 = vld [vmem:[%s1525_s11 + $0xd0] ss:$8 sps:$4 sm:$0xff]   ;;  %v1168_v29 = vld [vmem:[%s1525_s11 + $0xc4] ss:$8 sps:$4 sm:$0xff]  }
  0x5b   : > { %v614_v21 = vpack.c.bf16 %v610_v18, %v610_v18  ;;  %v1170_v30 = vld [vmem:[%s1525_s11 + $0xc0] ss:$8 sps:$4 sm:$0xff]   ;;  %v1171_v31 = vld [vmem:[%s1525_s11 + $0xb4] ss:$8 sps:$4 sm:$0xff]   ;;  %v1173_v32 = vld [vmem:[%s1525_s11 + $0xb0] ss:$8 sps:$4 sm:$0xff]  }
  0x5c   : > { %551 = vmatpush1.bf16.msra.mxu0 %v1143_v6  ;;  %620 = vmatpush1.bf16.msra.mxu1 %v1143_v6  ;;  %v1174_v33 = vld [vmem:[%s1525_s11 + $0xa4] ss:$8 sps:$4 sm:$0xff]   ;;  %v1176_v34 = vld [vmem:[%s1525_s11 + $0xa0] ss:$8 sps:$4 sm:$0xff]   ;;  %v1177_v35 = vld [vmem:[%s1525_s11 + $0x94] ss:$8 sps:$4 sm:$0xff]  }
  0x5d   : > { %552 = vmatprep.subr.bf16.mxu0 %v1144_v7  ;;  %621 = vmatprep.subr.bf16.mxu1 %v1144_v7  ;;  %v1179_v36 = vld [vmem:[%s1525_s11 + $0x90] ss:$8 sps:$4 sm:$0xff]   ;;  %v1180_v37 = vld [vmem:[%s1525_s11 + $0x84] ss:$8 sps:$4 sm:$0xff]   ;;  %v1182_v38 = vld [vmem:[%s1525_s11 + $0x80] ss:$8 sps:$4 sm:$0xff]  }
  0x5e   : > { %578 = vmatprep.mubr.bf16.mxu0 %v385_v20  ;;  %647 = vmatprep.mubr.bf16.mxu1 %v614_v21  ;;  %v1363_v41 = vmov 1983009808   ;;  %v1574_v45 = vshrl.u32 %v593_v43, 7  ;;  %v371_v53 = vld [vmem:[#allocation2] sm:$0xf]  ;;  %p1049_p7 = scmp.ne.s32.totalorder %s1347_s21, 2 }
  0x5f   : > { %v591_v42 = vunpack.c.l.s4 %v1363_v41  ;;  %v600_v54 = vld [vmem:[#allocation3] sm:$0xf] }
  0x60   : > { %553 = vmatpush1.bf16.msra.mxu0 %v1146_v8  ;;  %622 = vmatpush1.bf16.msra.mxu1 %v1146_v8 }
  0x61   : > { %554 = vmatprep.subr.bf16.mxu0 %v1147_v9  ;;  %623 = vmatprep.subr.bf16.mxu1 %v1147_v9  ;;  %v592_v44 = vunpack.c.0.s8 %v591_v42 }
  0x63   : > { %v1577_v48 = vsub.s32 %v592_v44, %v1574_v45 }
  0x64   : > { %555 = vmatpush1.bf16.msra.mxu0 %v1149_v10  ;;  %624 = vmatpush1.bf16.msra.mxu1 %v1149_v10 }
  0x65   : > { %556 = vmatprep.subr.bf16.mxu0 %v1150_v11  ;;  %625 = vmatprep.subr.bf16.mxu1 %v1150_v11 }
  0x68   : > { %557 = vmatpush1.bf16.msra.mxu0 %v1152_v12  ;;  %626 = vmatpush1.bf16.msra.mxu1 %v1152_v12 }
  0x69   : > { %558 = vmatprep.subr.bf16.mxu0 %v1153_v13  ;;  %627 = vmatprep.subr.bf16.mxu1 %v1153_v13 }
  0x6c   : > { %559 = vmatpush1.bf16.msra.mxu0 %v1155_v17  ;;  %628 = vmatpush1.bf16.msra.mxu1 %v1155_v17 }
  0x6d   : > { %560 = vmatprep.subr.bf16.mxu0 %v1156_v19  ;;  %629 = vmatprep.subr.bf16.mxu1 %v1156_v19 }
  0x70   : > { %561 = vmatpush1.bf16.msra.mxu0 %v1158_v22  ;;  %630 = vmatpush1.bf16.msra.mxu1 %v1158_v22 }
  0x71   : > { %562 = vmatprep.subr.bf16.mxu0 %v1159_v23  ;;  %631 = vmatprep.subr.bf16.mxu1 %v1159_v23 }
  0x74   : > { %563 = vmatpush2.bf16.msra.mxu0 %v1161_v24  ;;  %632 = vmatpush2.bf16.msra.mxu1 %v1161_v24 }
  0x75   : > { %564 = vmatprep.subr.bf16.mxu0 %v1162_v25  ;;  %633 = vmatprep.subr.bf16.mxu1 %v1162_v25 }
  0x78   : > { %565 = vmatpush2.bf16.msra.mxu0 %v1164_v26  ;;  %634 = vmatpush2.bf16.msra.mxu1 %v1164_v26 }
  0x79   : > { %566 = vmatprep.subr.bf16.mxu0 %v1165_v27  ;;  %635 = vmatprep.subr.bf16.mxu1 %v1165_v27 }
  0x7c   : > { %567 = vmatpush2.bf16.msra.mxu0 %v1167_v28  ;;  %636 = vmatpush2.bf16.msra.mxu1 %v1167_v28 }
  0x7d   : > { %568 = vmatprep.subr.bf16.mxu0 %v1168_v29  ;;  %637 = vmatprep.subr.bf16.mxu1 %v1168_v29 }
  0x80   : > { %569 = vmatpush2.bf16.msra.mxu0 %v1170_v30  ;;  %638 = vmatpush2.bf16.msra.mxu1 %v1170_v30 }
  0x81   : > { %570 = vmatprep.subr.bf16.mxu0 %v1171_v31  ;;  %639 = vmatprep.subr.bf16.mxu1 %v1171_v31 }
  0x84   : > { %571 = vmatpush2.bf16.msra.mxu0 %v1173_v32  ;;  %640 = vmatpush2.bf16.msra.mxu1 %v1173_v32 }
  0x85   : > { %572 = vmatprep.subr.bf16.mxu0 %v1174_v33  ;;  %641 = vmatprep.subr.bf16.mxu1 %v1174_v33 }
  0x88   : > { %573 = vmatpush2.bf16.msra.mxu0 %v1176_v34  ;;  %642 = vmatpush2.bf16.msra.mxu1 %v1176_v34 }
  0x89   : > { %574 = vmatprep.subr.bf16.mxu0 %v1177_v35  ;;  %643 = vmatprep.subr.bf16.mxu1 %v1177_v35 }
  0x8c   : > { %575 = vmatpush2.bf16.msra.mxu0 %v1179_v36  ;;  %644 = vmatpush2.bf16.msra.mxu1 %v1179_v36 }
  0x8d   : > { %576 = vmatprep.subr.bf16.mxu0 %v1180_v37  ;;  %645 = vmatprep.subr.bf16.mxu1 %v1180_v37 }
  0x90   : > { %577 = vmatpush2.bf16.msra.mxu0 %v1182_v38  ;;  %646 = vmatpush2.bf16.msra.mxu1 %v1182_v38 }
  0x93   : > { %579 = vmatmul.mubr.bf16.vlgmr.msra.gmra.mxu0 %v384_v39  ;;  %648 = vmatmul.mubr.bf16.vlgmr.msra.gmra.mxu1 %v613_v40 }
 0x153   : > { %v580_v46 = vpop.f32.mrf.mxu0  ;;  %v649_v47 = vpop.f32.mrf.mxu1 }
 0x155   : > { %v582_v49 = vpop.f32.mrf.mxu0  ;;  %v651_v50 = vpop.f32.mrf.mxu1 }
 0x156   : > { %v589_v51 = vcombine.low %v580_v46, %v582_v49  ;;  %v658_v52 = vcombine.low %v649_v47, %v651_v50 }
 0x157   : > { %v584_v55 = vpop.f32.mrf.mxu0  ;;  %v653_v56 = vpop.f32.mrf.mxu1 }
 0x158   : > { %v596_v57 = vrot.slane %v589_v51, %v1577_v48  ;;  %v665_v58 = vrot.slane %v658_v52, %v1577_v48  ;;  %672 = sbr.rel (%p1049_p7) target bundleno = 899 (0x383), region = 60 }
 0x159   : > { %v585_v59 = vpop.f32.mrf.mxu0  ;;  %v654_v60 = vpop.f32.mrf.mxu1 }
 0x15a   : > { %v598_v61 = vadd.f32 %v596_v57, %v371_v53  ;;  %v667_v62 = vadd.f32 %v665_v58, %v600_v54 }
 0x15c   : > { %599 = vst [vmem:[#allocation2] sm:$0xf] %v598_v61  ;;  %668 = vst [vmem:[#allocation3] sm:$0xf] %v667_v62 }
 0x15d   : > { %v674_v63 = vld [vmem:[%s1635_s3] sm:$0x3]  ;;  %v678_v0 = vsub.s32 0, %v1574_v45  ;;  %v682_v1 = vsub.s32 1, %v1574_v45  ;;  %vm708_vm0 = vcmask 1041408   ;;  %vm876_vm1 = vcmask 8192  }
 0x15e   : > { %v1364_v24 = vmov 269488144   ;;  %v782_v41 = vld [vmem:[%s1636_s4] sm:$0x3] }
 0x15f   : > { %v679_v2 = vrot.slane %v674_v63, %v678_v0  ;;  %v683_v3 = vrot.slane %v674_v63, %v682_v1  ;;  %v717_v25 = vunpack.c.l.s4 %v1364_v24  ;;  %v791_v42 = vrot.slane %v782_v41, %v682_v1 }
 0x160   : > { %v787_v50 = vrot.slane %v782_v41, %v678_v0 }
 0x161   : > { %v684_v4 = vcombine.low %v679_v2, %v683_v3  ;;  %v718_v26 = vunpack.c.0.s8 %v717_v25  ;;  %869 = vmatprep.mubr.f32.mxu0 %v791_v42 }
 0x163   : > { %v673_v5 = vld [vmem:[#allocation2] sm:$0xf]  ;;  %v694_v6 = vld [vmem:[#allocation3] sm:$0xf]  ;;  %v691_v7 = vrot.slane %v684_v4, %v1577_v48  ;;  %v721_v27 = vsub.s32 %v718_v26, %v1574_v45 }
 0x165   : > { %v693_v8 = vadd.f32 %v691_v7, %v673_v5  ;;  %v695_v9 = vadd.f32 %v694_v6, %v691_v7 }
 0x167   : > { %v696_v10 = vmul.f32 %v693_v8, %v693_v8  ;;  %v725_v11 = vmul.f32 %v695_v9, %v695_v9 }
 0x169   : > { %v704_v12 = vrot.slane %v696_v10, %v1577_v48  ;;  %v733_v13 = vrot.slane %v725_v11, %v1577_v48 }
 0x16b   : > { %v705_v14 = vcombine.high %v704_v12, %v704_v12  ;;  %v709_v15 = vsel %vm708_vm0, %v704_v12, 0.0  ;;  %v734_v16 = vcombine.high %v733_v13, %v733_v13  ;;  %v737_v18 = vsel %vm708_vm0, %v733_v13, 0.0 }
 0x16d   : > { %v710_v17 = vsel %vm708_vm0, %v705_v14, 0.0  ;;  %v738_v19 = vsel %vm708_vm0, %v734_v16, 0.0 }
 0x16e   : > { %v711_v20 = vadd.f32 %v710_v17, %v709_v15  ;;  %v739_v21 = vadd.f32 %v738_v19, %v737_v18 }
 0x170   : > { %712 = vadd.xlane.f32.xlu0 %v711_v20 }
 0x174   : > { %740 = vadd.xlane.f32.xlu0 %v739_v21 }
 0x1f9   : > { %v713_v22 = vpop.xlane.xlu0 %712 }
 0x1fa   : > { %1183 = vrsqrt.f32 %v713_v22 }
 0x1fd   : > { %v741_v23 = vpop.xlane.xlu0 %740 }
 0x1fe   : > { %1185 = vrsqrt.f32 %v741_v23 }
 0x207   : > { %v1184_v28 = vpop.eup %1183 }
 0x208   : > { %v722_v29 = vrot.slane %v1184_v28, %v721_v27 }
 0x20a   : > { %v724_v32 = vmul.f32 %v722_v29, %v693_v8 }
 0x20b   : > { %v1186_v30 = vpop.eup %1185 }
 0x20c   : > { %v750_v31 = vrot.slane %v1186_v30, %v721_v27 }
 0x20e   : > { %v752_v33 = vmul.f32 %v750_v31, %v695_v9 }
 0x210   : > { %v753_v34 = vsub.f32 %v752_v33, %v724_v32 }
 0x212   : > { %v754_v35 = vmul.f32 %v753_v34, %v753_v34 }
 0x214   : > { %v762_v36 = vrot.slane %v754_v35, %v1577_v48 }
 0x216   : > { %v763_v37 = vcombine.high %v762_v36, %v762_v36  ;;  %v766_v38 = vsel %vm708_vm0, %v762_v36, 0.0 }
 0x218   : > { %v767_v39 = vsel %vm708_vm0, %v763_v37, 0.0 }
 0x219   : > { %v768_v40 = vadd.f32 %v767_v39, %v766_v38 }
 0x21b   : > { %769 = vadd.xlane.f32.xlu1 %v768_v40 }
 0x2a4   : > { %v770_v43 = vpop.xlane.xlu1 %769 }
 0x2a5   : > { %1187 = vrsqrt.f32 %v770_v43 }
 0x2b2   : > { %v1188_v44 = vpop.eup %1187 }
 0x2b3   : > { %v779_v45 = vrot.slane %v1188_v44, %v721_v27 }
 0x2b5   : > { %v781_v46 = vmul.f32 %v779_v45, %v753_v34 }
 0x2b7   : > { %v801_v47 = vrot.slane %v781_v46, %v1577_v48 }
 0x2b9   : > { %v802_v49 = vcombine.high %v801_v47, %v801_v47 }
 0x2bb   : > { %835 = vmatprep.subr.mxu0 %v802_v49 }
 0x2bc   : > { %836 = vmatpush1.xpose.msra.mxu0 %v801_v47 }
 0x2bf   : > { %870 = vmatmul.mubr.f32.vlgmr.msra.gmra.mxu0 %v787_v50 }
 0x37f   : > { %v871_v51 = vpop.f32.mrf.mxu0 }
 0x380   : > { %v875_v52 = vsub.f32 1.0, %v871_v51 }
 0x381   : > { %v873_v53 = vpop.f32.mrf.mxu0 }
 0x382   : > { %877 = vst.msk [vmem:[#allocation10] sm:$0x1] %vm876_vm1, %v875_v52 }
 0x383 PF: > { %p1079_p10 = scmp.eq.s32.totalorder %s1425_s24, 2  ;;  %s1365_s7 = smov [#allocation10]  }
 0x384   : > { %s887_s13 = sshll.u32 %s1365_s7, 4  ;;  %s888_s13 = int_to_ptr.vmem [resolvable:$true] %s887_s13 }
 0x385   : > { %s1273_s1 = scalar_lea.vmem %s888_s13, 16  ;;  %s1279_s25 = scalar_lea.vmem %s888_s13, 32 }
 0x386   : > { %p1274_p6 = scmp.ne.s32.totalorder %s888_s13, %s1273_s1  ;;  %p1280_p2 = scmp.lt.s32.totalorder %s888_s13, %s888_s13 }
 0x387   : > { %p1281_p3 = scmp.lt.s32.totalorder %s1279_s25, %s1273_s1 }
 0x388   : > { %p1275_p0 = pnand %p1274_p6, %p1079_p10 }
 0x389   : > { %p1282_p4 = por %p1281_p3, %p1280_p2 }
 0x38a   : > { %p1276_p1 = pneg %p1275_p0 }
 0x38c   : > { %p1283_p5 = pnand %p1282_p4, %p1276_p1 }
 0x38e   : > { %1286 = shalt.err (!%p1283_p5)
}
 0x38f   : > { %1065 = dma.vmem_to_hbm [thread:$0]  (%p1079_p10), %s888_s13, 16, %s1637_s5, [#allocation6]  }
 0x390   : > { %1330 = dma.done.wait (%p1079_p10), [#allocation6], 16  }
 0x391   : > { %1332 = vsyncadd (%p1079_p10), [#allocation6], 4294967280 }
 0x392 PF: > { %s22_s23 = sadd.s32 1, %s1355_s23   ;;  %s1645_s26 = sld [smem:[#allocation14_spill]] }
 0x393   : > { %p19_p8 = scmp.ge.s32.totalorder %s22_s23, 5   ;;  %s1646_s18 = smov %s1339_s19 }
 0x394   : > { %s1647_s19 = smov %s1343_s20  ;;  %s1648_s20 = smov %s1444_s29 }
 0x395   : > { %s1649_s21 = smov %s1351_s22  ;;  %21 = sbr.rel (!%p19_p8) target bundleno = 9 (0x9), region = 110 }
 0x398   : > { %s1650_s22 = smov %s1645_s26 }
 0x39a   :  { %900 = vsyncpa [#allocation5], 1 }
 0x39b   :  { %902 = vsyncpa [#allocation5 + $0x1], 1 }
 0x39c   :  { %903 = vsyncpa [#allocation8], 1 }
 0x39d   :  { %905 = vsyncpa [#allocation8 + $0x1], 1 }
 0x39e   :  { %906 = vsyncpa [#allocation6], 1 }
 0x39f   :  { %908 = vsyncpa [#allocation6 + $0x1], 1 }

</bundles_post_ra>
